<compile_context>
chip_gen: v7x
topology: tpu7x:2x2x1
jax: 0.10.0
libtpu: 0.0.40
codegen_flags: <defaults>
</compile_context>

<pallas_src>
import jax
import jax.numpy as jnp
from jax.experimental import pallas as pl
from jax.experimental.pallas import tpu as pltpu


def _particle_crusher_kernel(x_ref, off_ref, o_ref):
    """x_ref: (Bt, 1, E), off_ref: (1, P, E), o_ref: (Bt, 1, P*E)."""
    expanded = x_ref[...] + off_ref[...]                # (Bt, P, E) broadcast add (VPU)
    bt, p, e = expanded.shape
    # Merge (P, E) into one lane-dense last dim so stores are unmasked, full-width.
    o_ref[...] = expanded.reshape(bt, 1, p * e).astype(o_ref.dtype)


def _choose_batch_tile(batch, particles, emb, itemsize, target_block_bytes=2 << 20):
    """Few, fat grid steps: largest Bt whose (double-buffered) output block stays
    comfortably inside scoped VMEM, but keep >= 2 grid steps when B >= 2 so the
    'parallel' batch axis can still split across two TensorCores on v7x."""
    rows = max(1, target_block_bytes // max(1, particles * emb * itemsize))
    bt = max(1, min(batch, rows))
    if batch >= 2 and bt >= batch:
        bt = pl.cdiv(batch, 2)
    return bt


def particle_crusher(batch_of_embeddings, off_sets):
    """batch_of_embeddings: (B, E); off_sets: (1, P, E) -> (B, P, E)."""
    B, E = batch_of_embeddings.shape
    _, P, E2 = off_sets.shape
    assert E == E2, "embedding size mismatch"

    itemsize = jnp.dtype(batch_of_embeddings.dtype).itemsize
    Bt = _choose_batch_tile(B, P, E, itemsize)
    grid = (pl.cdiv(B, Bt),)

    x3 = batch_of_embeddings.reshape(B, 1, E)           # free metadata reshape

    out_flat = pl.pallas_call(
        _particle_crusher_kernel,
        out_shape=jax.ShapeDtypeStruct((B, 1, P * E), batch_of_embeddings.dtype),
        grid_spec=pl.GridSpec(
            grid=grid,
            in_specs=[
                pl.BlockSpec((Bt, 1, E), lambda i: (i, 0, 0)),   # per-batch-tile input
                pl.BlockSpec((1, P, E), lambda i: (0, 0, 0)),    # constant offsets (fetched once)
            ],
            out_specs=pl.BlockSpec((Bt, 1, P * E), lambda i: (i, 0, 0)),
        ),
        compiler_params=pltpu.CompilerParams(
            dimension_semantics=("parallel",),
        ),
    )(x3, off_sets)

    return out_flat.reshape(B, P, E)


def particle_crusher_ref(batch_of_embeddings, off_sets):
    """Pure-JAX reference mirroring the PyTorch forward."""
    B, E = batch_of_embeddings.shape
    return batch_of_embeddings.reshape(B, 1, E) + off_sets


if __name__ == "__main__":
    B, P, E = 2, 8, 32        # batch, num_particles, embedding_size

    key = jax.random.PRNGKey(0)
    kx, ko = jax.random.split(key, 2)

    x = jax.random.normal(kx, (B, E), dtype=jnp.float32)
    # The nn.Parameter is zero-initialized in the module; use small random values
    # here so the broadcast-add path is actually exercised by the check.
    off_sets = 0.02 * jax.random.normal(ko, (1, P, E), dtype=jnp.float32)

    out = particle_crusher(x, off_sets)
    out = jax.block_until_ready(out)

    ref = particle_crusher_ref(x, off_sets)
    assert out.shape == (B, P, E)
    assert jnp.allclose(out, ref, atol=1e-6, rtol=1e-6), "mismatch vs reference"

    print("KERNEL_OK")
</pallas_src>

<mosaic_0001>
module attributes {stable_mosaic.version = 11 : i64} {
  func.func @_particle_crusher_kernel(%arg0: i32, %arg1: memref<1x1x32xf32, #tpu.memory_space<vmem>>, %arg2: memref<1x8x32xf32, #tpu.memory_space<vmem>>, %arg3: memref<1x1x256xf32, #tpu.memory_space<vmem>>) attributes {dimension_semantics = [#tpu.dimension_semantics<parallel>], iteration_bounds = array<i64: 2>, scalar_prefetch = 0 : i64, scratch_operands = 0 : i64, tpu.core_type = #tpu.core_type<tc>, window_params = [{transform_indices = @transform_0, window_bounds = array<i64: 1, 1, 32>}, {pipeline_mode = #tpu.pipeline_mode<synchronous>, transform_indices = @transform_1, window_bounds = array<i64: 1, 8, 32>}, {transform_indices = @transform_2, window_bounds = array<i64: 1, 1, 256>}]} {
    %c0 = arith.constant 0 : index
    %c0_0 = arith.constant 0 : index
    %c0_1 = arith.constant 0 : index
    %0 = vector.load %arg1[%c0, %c0_0, %c0_1] : memref<1x1x32xf32, #tpu.memory_space<vmem>>, vector<1x1x32xf32>
    %c0_2 = arith.constant 0 : index
    %c0_3 = arith.constant 0 : index
    %c0_4 = arith.constant 0 : index
    %1 = vector.load %arg2[%c0_2, %c0_3, %c0_4] : memref<1x8x32xf32, #tpu.memory_space<vmem>>, vector<1x8x32xf32>
    %2 = vector.broadcast %0 : vector<1x1x32xf32> to vector<1x8x32xf32>
    %3 = arith.addf %2, %1 : vector<1x8x32xf32>
    %4 = vector.shape_cast %3 : vector<1x8x32xf32> to vector<1x1x256xf32>
    %c0_5 = arith.constant 0 : index
    %c0_6 = arith.constant 0 : index
    %c0_7 = arith.constant 0 : index
    %5 = vector.load %arg3[%c0_5, %c0_6, %c0_7] : memref<1x1x256xf32, #tpu.memory_space<vmem>>, vector<1x1x256xf32>
    tpu.vector_store %arg3[%c0_5, %c0_6, %c0_7], %4 {strides = array<i32>} : memref<1x1x256xf32, #tpu.memory_space<vmem>>, vector<1x1x256xf32>,
    return
  }
  func.func @transform_0(%arg0: i32) -> (i32, i32, i32) {
    %c0_i32 = arith.constant 0 : i32
    %c0_i32_0 = arith.constant 0 : i32
    %c0_i32_1 = arith.constant 0 : i32
    return %arg0, %c0_i32, %c0_i32_0 : i32, i32, i32
  }
  func.func @transform_1(%arg0: i32) -> (i32, i32, i32) {
    %c0_i32 = arith.constant 0 : i32
    %c0_i32_0 = arith.constant 0 : i32
    %c0_i32_1 = arith.constant 0 : i32
    %c0_i32_2 = arith.constant 0 : i32
    return %c0_i32, %c0_i32_0, %c0_i32_1 : i32, i32, i32
  }
  func.func @transform_2(%arg0: i32) -> (i32, i32, i32) {
    %c0_i32 = arith.constant 0 : i32
    %c0_i32_0 = arith.constant 0 : i32
    %c0_i32_1 = arith.constant 0 : i32
    return %arg0, %c0_i32, %c0_i32_0 : i32, i32, i32
  }
}

</mosaic_0001>

<bundles_post_ra>
// kernel: tpu_custom_call.1
= control target key start
LH: loop header
LB: loop body
LE: loop exit
PB: predicated region body
PF: predicated region fallthrough
CT: control target
= control target key end

     0   :  { %7 = vsyncpa [#allocation3], 0  ;;  %s811_s0 = inlined_call_operand.hbm [shape: f32[2,1,32], index: 0, kind: input, shape index: {}]   ;;  %s812_s1 = inlined_call_operand.hbm [shape: f32[1,8,32], index: 1, kind: input, shape index: {}]   ;;  %s813_s2 = inlined_call_operand.hbm [shape: f32[2,1,256], index: 2, kind: output, shape index: {}]  }
   0x1   :  { %9 = vsyncpa [#allocation3 + $0x1], 0 }
   0x2   :  { %10 = vsyncpa [#allocation6], 0 }
   0x3   :  { %11 = vsyncpa [#allocation4], 0 }
   0x4   :  { %13 = vsyncpa [#allocation4 + $0x1], 0  ;;  %s609_s9 = smov 0   ;;  %s611_s10 = smov 0  }
   0x5   :  { %s613_s11 = smov 0   ;;  %s615_s12 = smov 0  }
   0x6 LB: > { %s630_s13 = sadd.s32 4294967295, %s582_s12   ;;  %s375_s14 = sadd.s32 4294967294, %s582_s12   ;;  %s582_s12 = sphi %s615_s12, %s837_s12   ;;  %s578_s11 = sphi %s613_s11, %s836_s11   ;;  %s574_s10 = sphi %s611_s10, %s835_s10   ;;  %s570_s9 = sphi %s609_s9, %s834_s9  }
   0x7   : > { %p39_p0 = scmp.ne.s32.totalorder %s574_s10, %s570_s9  ;;  %p814_p1 = scmp.eq.s32.totalorder %s630_s13, 0 }
   0x8   : > { %p90_p3 = scmp.eq.s32.totalorder %s375_s14, 1  ;;  %p376_p5 = scmp.ge.s32.totalorder %s582_s12, 1 }
   0x9   : > { %p639_p4 = por %p814_p1, %p39_p0  ;;  %p97_p7 = scmp.lt.s32.totalorder %s582_s12, 3 }
   0xa   : > { %p644_p6 = por %p90_p3, %p39_p0  ;;  %s584_s18 = smov [#allocation5]  }
   0xb   : > { %s817_s15 = scalar_select %p639_p4, 1, 0 }
   0xc   : > { %s818_s16 = scalar_select %p644_p6, 1, 0 }
   0xd   : > { %p649_p8 = pnand %p376_p5, %p97_p7  ;;  %s110_s19 = sshll.u32 %s584_s18, 4  ;;  %s111_s19 = int_to_ptr.vmem [resolvable:$true] %s110_s19 }
   0xe   : > { %s657_s20 = sadd.s32 1, %s582_s12   ;;  %s26_s24 = sadd.s32 1, %s578_s11 }
   0xf   : > { %s819_s17 = scalar_select %p649_p8, 1, 0 }
  0x10   : > { %p398_p10 = pneg %p649_p8  ;;  %s23_s22 = ssub.s32 %s582_s12, %s657_s20 }
  0x11   : > { %p667_p12 = scmp.eq.s32.totalorder %s23_s22, 0  ;;  %s454_s27 = scalar_lea.hbm %s812_s1, 128 }
  0x12   : > { %p661_p11 = pnand %p398_p10, %p814_p1  ;;  %p455_p0 = scmp.ne.s32.totalorder %s812_s1, %s454_s27 }
  0x13   : > { %s821_s23 = scalar_select %p667_p12, 1, 0 }
  0x14   : > { %p456_p3 = pneg %p661_p11  ;;  %p461_p10 = scmp.lt.u32.totalorder %s454_s27, %s812_s1 }
  0x16   : > { %p457_p5 = pnand %p456_p3, %p455_p0 }
  0x18   : > { %p458_p7 = pneg %p457_p5 }
  0x1a   : > { %p463_p9 = pnand %p461_p10, %p458_p7 }
  0x1c   : > { %466 = shalt.err (!%p463_p9)
}
  0x1d   : > { %s467_s4 = scalar_lea.vmem %s111_s19, 128  ;;  %p475_p6 = scmp.lt.s32.totalorder %s111_s19, %s111_s19 }
  0x1e   : > { %p468_p1 = scmp.ne.s32.totalorder %s111_s19, %s467_s4  ;;  %p476_p4 = scmp.lt.s32.totalorder %s467_s4, %s467_s4 }
  0x20   : > { %p470_p2 = pnand %p468_p1, %p456_p3  ;;  %p477_p8 = por %p476_p4, %p475_p6 }
  0x22   : > { %p471_p13 = pneg %p470_p2 }
  0x24   : > { %p478_p12 = pnand %p477_p8, %p471_p13 }
  0x26   : > { %481 = shalt.err (!%p478_p12)
}
  0x27   : > { %401 = dma.hbm_to_vmem [thread:$0]  (!%p661_p11), %s812_s1, 128, %s111_s19, [#allocation6]  }
  0x28   : > { %p822_p1 = scmp.ne.s32.totalorder %s821_s23, 0  ;;  %p34_p2 = scmp.eq.s32.totalorder %s582_s12, 0 }
  0x29   : > { %p823_p4 = scmp.ne.s32.totalorder %s578_s11, %s574_s10  ;;  %p824_p6 = scmp.eq.s32.totalorder %s630_s13, 1 }
  0x2a   : > { %s693_s7 = scalar_select %p822_p1, %s578_s11, %s26_s24  }
  0x2b   : > { %p701_p8 = por %p824_p6, %p823_p4  ;;  %p411_p9 = scmp.lt.s32.totalorder %s582_s12, 2 }
  0x2c   : > { %s121_s14 = sand.u32 1, %s578_s11   ;;  %p826_p12 = pmov %p823_p4 }
  0x2d   : > { %s379_s18 = sshll.u32 %s582_s12, 4  ;;  %s124_s19 = scalar_lea.vmem [#allocation2], %s121_s14 }
  0x2e   : > { %p35_p13 = por %p34_p2, %p826_p12  ;;  %s714_s25 = scalar_lea.hbm %s811_s0, %s379_s18 }
  0x2f   : > { %s131_s23 = sshll.u32 %s124_s19, 4  ;;  %s122_s26 = scalar_lea.sflag [#allocation3], %s121_s14  ;;  %s716_s23 = int_to_ptr.vmem [resolvable:$true] %s131_s23 }
  0x30   : > { %p718_p11 = pnand %p411_p9, %p35_p13  ;;  %s482_s27 = scalar_lea.hbm %s714_s25, 16 }
  0x31   : > { %p483_p0 = scmp.ne.s32.totalorder %s714_s25, %s482_s27  ;;  %s487_s30 = scalar_lea.hbm %s811_s0, 32 }
  0x32   : > { %p484_p3 = pneg %p718_p11  ;;  %p488_p10 = scmp.lt.u32.totalorder %s714_s25, %s811_s0 }
  0x33   : > { %p489_p1 = scmp.lt.u32.totalorder %s487_s30, %s482_s27  ;;  %p491_p4 = scmp.lt.u32.totalorder %s482_s27, %s714_s25 }
  0x34   : > { %p485_p5 = pnand %p484_p3, %p483_p0 }
  0x35   : > { %p490_p2 = por %p489_p1, %p488_p10 }
  0x36   : > { %p486_p7 = pneg %p485_p5 }
  0x37   : > { %p492_p6 = por %p491_p4, %p490_p2 }
  0x39   : > { %p493_p9 = pnand %p492_p6, %p486_p7 }
  0x3b   : > { %496 = shalt.err (!%p493_p9)
}
  0x3c   : > { %s497_s5 = scalar_lea.vmem %s716_s23, 16  ;;  %s585_s6 = smov [#allocation2]  }
  0x3d   : > { %p498_p12 = scmp.ne.s32.totalorder %s716_s23, %s497_s5  ;;  %s502_s14 = sshll.u32 %s585_s6, 4  ;;  %s503_s14 = int_to_ptr.vmem [resolvable:$false] %s502_s14 }
  0x3e   : > { %s504_s18 = scalar_lea.vmem %s503_s14, 32  ;;  %p505_p5 = scmp.lt.s32.totalorder %s716_s23, %s503_s14 }
  0x3f   : > { %p500_p13 = pnand %p498_p12, %p484_p3  ;;  %p506_p10 = scmp.lt.s32.totalorder %s504_s18, %s497_s5 }
  0x41   : > { %p501_p0 = pneg %p500_p13  ;;  %p507_p1 = por %p506_p10, %p505_p5 }
  0x43   : > { %p508_p2 = pnand %p507_p1, %p501_p0 }
  0x45   : > { %511 = shalt.err (!%p508_p2)
}
  0x46   : > { %405 = dma.hbm_to_vmem [thread:$0]  (!%p718_p11), %s714_s25, 16, %s716_s23, %s122_s26  }
  0x47   : > { %p828_p7 = scmp.ne.s32.totalorder %s819_s17, 0 }
  0x48   : > { %s750_s21 = sand.u32 (!%p828_p7), 1, %s574_s10   ;;  %p829_p3 = scmp.ne.s32.totalorder (!%p828_p7), %s817_s15, 0 }
  0x49   : > { %140 = sbr.rel (%p828_p7) target bundleno = 241 (0xf1), region = 28  ;;  %s143_s22 = scalar_lea.sflag (!%p828_p7), [#allocation3], %s750_s21 }
  0x4a   : > { %s145_s19 = scalar_lea.vmem (!%p828_p7), [#allocation2], %s750_s21 }
  0x50   : > { %557 = dma.done.wait (%p829_p3), %s143_s22, 16  }
  0x51   : > { %559 = vsyncadd (%p829_p3), %s143_s22, 4294967280  ;;  %p830_p4 = scmp.eq.s32.totalorder %s630_s13, 0 }
  0x53   : > { %561 = dma.done.wait (%p830_p4), [#allocation6], 128   ;;  %p831_p11 = pmov %p830_p4 }
  0x54   : > { %v182_v0 = vlaneseq  ;;  %v586_v1 = vmov 1983009808   ;;  %v587_v4 = vmov 1934713408   ;;  %v383_v9 = vld [vmem:[%s145_s19] ss:$0 sm:$0xff] }
  0x55   : > { %563 = vsyncadd (%p831_p11), [#allocation6], 4294967168  ;;  %v180_v2 = vunpack.c.l.s4 %v586_v1  ;;  %v195_v5 = vunpack.c.l.s4 %v587_v4  ;;  %v170_v10 = vld [vmem:[#allocation5] sm:$0xff]  ;;  %v588_v14 = vmov 0.0   ;;  %s589_s15 = smov 32   ;;  %s590_s17 = smov 64  }
  0x56   : > { %v183_v3 = vshrl.u32 %v182_v0, 7  ;;  %v177_v11 = vadd.f32 %v383_v9, %v170_v10  ;;  %s591_s25 = smov 96   ;;  %v592_v29 = vmov 1966171168   ;;  %vm251_vm0 = vcmask 261120   ;;  %s382_s23 = sshll.u32 %s750_s21, 1 }
  0x57   : > { %v181_v6 = vunpack.c.0.s8 %v180_v2  ;;  %v196_v7 = vunpack.c.0.s8 %v195_v5  ;;  %v264_v30 = vunpack.c.l.s4 %v592_v29  ;;  %vm253_vm1 = vcmask 523264   ;;  %s389_s24 = sshll.u32 %s630_s13, 5  ;;  %s168_s26 = scalar_lea.vmem [#allocation7], %s382_s23 }
  0x58   : > { %v178_v15 = vcombine.high %v177_v11, %v588_v14  ;;  %vm255_vm2 = vcmask 785408   ;;  %s298_s27 = sshll.u32 %s168_s26, 4  ;;  %vm280_vm3 = vcmp.lt.s32.totalorder %v182_v0, 256  ;;  %s767_s30 = scalar_lea.hbm %s813_s2, %s389_s24  ;;  %s769_s27 = int_to_ptr.vmem [resolvable:$true] %s298_s27 }
  0x59   : > { %v184_v8 = vsub.s32 %v181_v6, %v183_v3  ;;  %v199_v12 = vsub.s32 %v196_v7, %v183_v3  ;;  %v265_v33 = vunpack.c.0.s8 %v264_v30  ;;  %s284_s3 = scalar_lea.sflag [#allocation4], %s750_s21  ;;  %s512_s4 = scalar_lea.vmem %s769_s27, 32 }
  0x5a   : > { %p513_p6 = scmp.ne.s32.totalorder %s769_s27, %s512_s4  ;;  %s593_s13 = smov [#allocation7]  }
  0x5b   : > { %v185_v13 = vrot.slane %v177_v11, %v184_v8  ;;  %v192_v18 = vrot.slane %v178_v15, %v184_v8  ;;  %v268_v39 = vsub.s32 %v265_v33, %v183_v3  ;;  %s516_s5 = sshll.u32 %s593_s13, 4  ;;  %s517_s5 = int_to_ptr.vmem [resolvable:$false] %s516_s5 }
  0x5c   : > { %p514_p9 = pnand %p513_p6, %p701_p8  ;;  %s518_s6 = scalar_lea.vmem %s517_s5, 64 }
  0x5d   : > { %v200_v16 = vrot.slane %v185_v13, %v199_v12  ;;  %v193_v17 = vcombine.high %v185_v13, %v588_v14  ;;  %v215_v21 = vrot.slane %v192_v18, %v199_v12  ;;  %v208_v22 = vcombine.high %v192_v18, %v588_v14  ;;  %p519_p13 = scmp.lt.s32.totalorder %s769_s27, %s517_s5  ;;  %p520_p0 = scmp.lt.s32.totalorder %s518_s6, %s512_s4 }
  0x5e   : > { %p515_p12 = pneg %p514_p9 }
  0x5f   : > { %v223_v19 = vcombine.high %v200_v16, %v588_v14  ;;  %v207_v20 = vrot.slane %v193_v17, %v199_v12  ;;  %v225_v23 = vcombine.high %v215_v21, %v588_v14  ;;  %v222_v24 = vrot.slane %v208_v22, %v199_v12  ;;  %p521_p5 = por %p520_p0, %p519_p13 }
  0x61   : > { %228 = vrot.lane.b32.xlu0 %v223_v19, %s589_s15  ;;  %232 = vrot.lane.b32.xlu1 %v207_v20, %s590_s17  ;;  %v224_v25 = vcombine.high %v207_v20, %v588_v14  ;;  %v226_v26 = vcombine.high %v222_v24, %v588_v14  ;;  %p522_p10 = pnand %p521_p5, %p515_p12 }
  0x65   : > { %240 = vrot.lane.b32.xlu0 %v225_v23, %s589_s15  ;;  %244 = vrot.lane.b32.xlu1 %v222_v24, %s590_s17 }
  0x69   : > { %236 = vrot.lane.b32.xlu0 %v224_v25, %s591_s25  ;;  %248 = vrot.lane.b32.xlu1 %v226_v26, %s591_s25 }
  0xd3   : > { %v229_v27 = vpop.permute.xlu0 %228  ;;  %v233_v28 = vpop.permute.xlu1 %232 }
  0xd4   : > { %v252_v34 = vsel %vm251_vm0, %v200_v16, %v229_v27 }
  0xd5   : > { %v254_v36 = vsel %vm253_vm1, %v252_v34, %v233_v28 }
  0xd7   : > { %v241_v31 = vpop.permute.xlu0 %240  ;;  %v245_v32 = vpop.permute.xlu1 %244 }
  0xd8   : > { %v257_v35 = vsel %vm251_vm0, %v215_v21, %v241_v31 }
  0xd9   : > { %v258_v37 = vsel %vm253_vm1, %v257_v35, %v245_v32 }
  0xdb   : > { %v237_v38 = vpop.permute.xlu0 %236  ;;  %v249_v40 = vpop.permute.xlu1 %248 }
  0xdc   : > { %v256_v41 = vsel %vm255_vm2, %v254_v36, %v237_v38  ;;  %v259_v42 = vsel %vm255_vm2, %v258_v37, %v249_v40 }
  0xdd   : > { %v262_v43 = vcombine.low %v256_v41, %v259_v42 }
  0xdf   : > { %v269_v44 = vrot.slane %v262_v43, %v268_v39 }
  0xe1   : > { %v276_v45 = vrot.slane %v269_v44, %v268_v39 }
  0xe3   : > { %282 = vst.msk [vmem:[%s168_s26] sm:$0x3] %vm280_vm3, %v276_v45 }
  0xe4   : > { %525 = shalt.err (!%p522_p10)
}
  0xe5   : > { %s526_s14 = scalar_lea.hbm %s767_s30, 32  ;;  %s530_s22 = scalar_lea.hbm %s813_s2, 64 }
  0xe6   : > { %p527_p1 = scmp.ne.s32.totalorder %s767_s30, %s526_s14  ;;  %p531_p3 = scmp.lt.u32.totalorder %s767_s30, %s813_s2 }
  0xe7   : > { %p532_p4 = scmp.lt.u32.totalorder %s530_s22, %s526_s14  ;;  %p534_p6 = scmp.lt.u32.totalorder %s526_s14, %s767_s30 }
  0xe8   : > { %p528_p2 = pnand %p527_p1, %p701_p8 }
  0xe9   : > { %p533_p11 = por %p532_p4, %p531_p3 }
  0xea   : > { %p529_p7 = pneg %p528_p2 }
  0xeb   : > { %p535_p9 = por %p534_p6, %p533_p11 }
  0xed   : > { %p536_p12 = pnand %p535_p9, %p529_p7 }
  0xef   : > { %539 = shalt.err (!%p536_p12)
}
  0xf0   : > { %396 = dma.vmem_to_hbm [thread:$0]  (%p701_p8), %s769_s27, 32, %s767_s30, %s284_s3  }
  0xf1 PF: > { %s310_s17 = sand.u32 1, %s570_s9   ;;  %p832_p13 = scmp.ne.s32.totalorder %s818_s16, 0 }
  0xf2   : > { %p833_p0 = scmp.ge.s32.totalorder %s582_s12, 2  ;;  %s311_s25 = scalar_lea.sflag [#allocation4], %s310_s17 }
  0xf4   : > { %p407_p5 = pnand %p833_p0, %p832_p13 }
  0xf6   : > { %565 = dma.done.wait (!%p407_p5), %s311_s25, 32  }
  0xf7   : > { %567 = vsyncadd (!%p407_p5), %s311_s25, 4294967264  ;;  %p16_p10 = scmp.ge.s32.totalorder %s657_s20, 4   ;;  %s834_s9 = smov %s574_s10 }
  0xf8   : > { %s835_s10 = smov %s578_s11  ;;  %s836_s11 = smov %s693_s7 }
  0xf9   : > { %s837_s12 = smov %s657_s20  ;;  %18 = sbr.rel (!%p16_p10) target bundleno = 6 (0x6), region = 77 }
 0x100   :  { %316 = vsyncpa [#allocation3], 1 }
 0x101   :  { %318 = vsyncpa [#allocation3 + $0x1], 1 }
 0x102   :  { %319 = vsyncpa [#allocation6], 1 }
 0x103   :  { %320 = vsyncpa [#allocation4], 1 }
 0x104   :  { %322 = vsyncpa [#allocation4 + $0x1], 1 }

</bundles_post_ra>
